<compile_context>
chip_gen: v7x
topology: tpu7x:2x2x1
jax: 0.10.0
libtpu: 0.0.40
codegen_flags: <defaults>
</compile_context>

<pallas_src>
import functools

import jax
import jax.numpy as jnp
from jax.experimental import pallas as pl
from jax.experimental.pallas import tpu as pltpu


def _mse_rows_kernel(p_ref, g_ref, w_ref, o_ref, *, inv_hw):
    # p_ref, g_ref: (TM, HW) native dtype; w_ref: (TM, 1); o_ref: (TM, 1) f32
    diff = p_ref[...].astype(jnp.float32) - g_ref[...].astype(jnp.float32)
    # mean over W then H == mean over flattened H*W (equal counts per row)
    per_row = jnp.sum(diff * diff, axis=1, keepdims=True) * inv_hw       # (TM, 1)
    o_ref[...] = 0.5 * w_ref[...].astype(jnp.float32) * per_row          # (TM, 1)


def mse_loss(preds, heatmap_gt, weight, *, target_tile_bytes=4 * 1024 * 1024):
    """preds, heatmap_gt: (N, C, H, W); weight: (N, C). Returns scalar f32."""
    N, C, H, W = preds.shape
    NC, HW = N * C, H * W

    # Contiguous collapses — no data movement, no dtype change (native on wire).
    p = preds.reshape(NC, HW)
    g = heatmap_gt.reshape(NC, HW)
    w = weight.reshape(NC, 1)

    # Pick the largest NC tile with ~target_tile_bytes per input buffer.
    itemsize = max(jnp.dtype(p.dtype).itemsize, jnp.dtype(g.dtype).itemsize)
    rows = max(8, (target_tile_bytes // (HW * itemsize)) // 8 * 8)
    if rows >= NC:
        tm = NC                      # full extent: no (8, _) alignment needed
    else:
        tm = rows                    # multiple of 8; last block clipped on writeback
    num_tiles = pl.cdiv(NC, tm)

    kernel = functools.partial(_mse_rows_kernel, inv_hw=1.0 / HW)

    bytes_accessed = (p.size * p.dtype.itemsize
                      + g.size * g.dtype.itemsize
                      + w.size * w.dtype.itemsize
                      + NC * 4)

    per_map_losses = pl.pallas_call(
        kernel,
        out_shape=jax.ShapeDtypeStruct((NC, 1), jnp.float32),
        grid=(num_tiles,),
        in_specs=[
            pl.BlockSpec((tm, HW), lambda i: (i, 0)),   # preds rows
            pl.BlockSpec((tm, HW), lambda i: (i, 0)),   # gt rows
            pl.BlockSpec((tm, 1), lambda i: (i, 0)),    # weight rows
        ],
        out_specs=pl.BlockSpec((tm, 1), lambda i: (i, 0)),
        compiler_params=pltpu.CompilerParams(
            dimension_semantics=("parallel",),          # independent tiles -> megacore OK
            vmem_limit_bytes=48 * 1024 * 1024,
        ),
        cost_estimate=pl.CostEstimate(
            flops=3 * NC * HW,
            transcendentals=0,
            bytes_accessed=int(bytes_accessed),
        ),
    )(p, g, w)

    # mean over C then N == mean over flattened N*C (equal counts per group);
    # divide by the true NC so clipped/padded tiles never bias the result.
    return jnp.sum(per_map_losses) / NC


def _reference(preds, heatmap_gt, weight):
    # Pure-JAX reference mirroring the PyTorch forward exactly (f32 math).
    p = preds.astype(jnp.float32)
    g = heatmap_gt.astype(jnp.float32)
    w = weight.astype(jnp.float32)
    losses = 0.5 * w * jnp.mean(jnp.mean((p - g) ** 2, axis=3), axis=2)
    return jnp.mean(jnp.mean(losses, axis=1), axis=0)


if __name__ == "__main__":
    key = jax.random.PRNGKey(0)
    k1, k2, k3 = jax.random.split(key, 3)

    N, C, H, W = 2, 4, 16, 16
    preds = jax.random.normal(k1, (N, C, H, W), dtype=jnp.float32)
    heatmap_gt = jax.random.normal(k2, (N, C, H, W), dtype=jnp.float32)
    weight = jax.random.uniform(k3, (N, C), dtype=jnp.float32)

    # f32 path
    loss = mse_loss(preds, heatmap_gt, weight)
    jax.block_until_ready(loss)
    ref = _reference(preds, heatmap_gt, weight)
    assert jnp.allclose(loss, ref, rtol=1e-5, atol=1e-6), (loss, ref)

    # bf16-on-the-wire path (half the HBM bytes; accumulation stays f32 in-kernel)
    preds_bf16 = preds.astype(jnp.bfloat16)
    gt_bf16 = heatmap_gt.astype(jnp.bfloat16)
    loss_bf16 = mse_loss(preds_bf16, gt_bf16, weight)
    jax.block_until_ready(loss_bf16)
    ref_bf16 = _reference(preds_bf16, gt_bf16, weight)
    assert jnp.allclose(loss_bf16, ref_bf16, rtol=2e-2, atol=2e-2), (loss_bf16, ref_bf16)

    print("KERNEL_OK")
</pallas_src>

<mosaic_0001>
module attributes {stable_mosaic.version = 11 : i64} {
  func.func @_mse_rows_kernel(%arg0: i32, %arg1: memref<8x256xf32, #tpu.memory_space<vmem>>, %arg2: memref<8x256xf32, #tpu.memory_space<vmem>>, %arg3: memref<8x1xf32, #tpu.memory_space<vmem>>, %arg4: memref<8x1xf32, #tpu.memory_space<vmem>>) attributes {dimension_semantics = [#tpu.dimension_semantics<parallel>], iteration_bounds = array<i64: 1>, scalar_prefetch = 0 : i64, scratch_operands = 0 : i64, tpu.core_type = #tpu.core_type<tc>, window_params = [{transform_indices = @transform_0, window_bounds = array<i64: 8, 256>}, {transform_indices = @transform_1, window_bounds = array<i64: 8, 256>}, {transform_indices = @transform_2, window_bounds = array<i64: 8, 1>}, {transform_indices = @transform_3, window_bounds = array<i64: 8, 1>}]} {
    %c0 = arith.constant 0 : index
    %c0_0 = arith.constant 0 : index
    %0 = vector.load %arg1[%c0, %c0_0] : memref<8x256xf32, #tpu.memory_space<vmem>>, vector<8x256xf32>
    %c0_1 = arith.constant 0 : index
    %c0_2 = arith.constant 0 : index
    %1 = vector.load %arg2[%c0_1, %c0_2] : memref<8x256xf32, #tpu.memory_space<vmem>>, vector<8x256xf32>
    %2 = arith.subf %0, %1 : vector<8x256xf32>
    %3 = arith.mulf %2, %2 : vector<8x256xf32>
    %cst = arith.constant dense<0.000000e+00> : vector<8xf32>
    %4 = vector.multi_reduction <add>, %3, %cst [1] : vector<8x256xf32> to vector<8xf32>
    %5 = vector.shape_cast %4 : vector<8xf32> to vector<8x1xf32>
    %cst_3 = arith.constant 3.906250e-03 : f32
    %6 = vector.broadcast %cst_3 : f32 to vector<8x1xf32>
    %7 = arith.mulf %5, %6 : vector<8x1xf32>
    %c0_4 = arith.constant 0 : index
    %c0_5 = arith.constant 0 : index
    %8 = vector.load %arg3[%c0_4, %c0_5] : memref<8x1xf32, #tpu.memory_space<vmem>>, vector<8x1xf32>
    %cst_6 = arith.constant 5.000000e-01 : f32
    %9 = vector.broadcast %cst_6 : f32 to vector<8x1xf32>
    %10 = arith.mulf %9, %8 : vector<8x1xf32>
    %11 = arith.mulf %10, %7 : vector<8x1xf32>
    %c0_7 = arith.constant 0 : index
    %c0_8 = arith.constant 0 : index
    %12 = vector.load %arg4[%c0_7, %c0_8] : memref<8x1xf32, #tpu.memory_space<vmem>>, vector<8x1xf32>
    tpu.vector_store %arg4[%c0_7, %c0_8], %11 {strides = array<i32>} : memref<8x1xf32, #tpu.memory_space<vmem>>, vector<8x1xf32>,
    return
  }
  func.func @transform_0(%arg0: i32) -> (i32, i32) {
    %c0_i32 = arith.constant 0 : i32
    %c0_i32_0 = arith.constant 0 : i32
    return %arg0, %c0_i32 : i32, i32
  }
  func.func @transform_1(%arg0: i32) -> (i32, i32) {
    %c0_i32 = arith.constant 0 : i32
    %c0_i32_0 = arith.constant 0 : i32
    return %arg0, %c0_i32 : i32, i32
  }
  func.func @transform_2(%arg0: i32) -> (i32, i32) {
    %c0_i32 = arith.constant 0 : i32
    %c0_i32_0 = arith.constant 0 : i32
    return %arg0, %c0_i32 : i32, i32
  }
  func.func @transform_3(%arg0: i32) -> (i32, i32) {
    %c0_i32 = arith.constant 0 : i32
    %c0_i32_0 = arith.constant 0 : i32
    return %arg0, %c0_i32 : i32, i32
  }
}

</mosaic_0001>

<bundles_post_ra>
// kernel: tpu_custom_call.1
= control target key start
LH: loop header
LB: loop body
LE: loop exit
PB: predicated region body
PF: predicated region fallthrough
CT: control target
= control target key end

     0   :  { %8 = vsyncpa [#allocation3], 0  ;;  %s163_s0 = inlined_call_operand.hbm [shape: f32[8,256], index: 0, kind: input, shape index: {}]   ;;  %s164_s1 = inlined_call_operand.hbm [shape: f32[8,256], index: 1, kind: input, shape index: {}]   ;;  %s165_s2 = inlined_call_operand.vmem [shape: f32[8,1], index: 2, kind: input, shape index: {}]   ;;  %s166_s3 = inlined_call_operand.vmem [shape: f32[8,1], index: 3, kind: output, shape index: {}]  }
   0x1   :  { %9 = vsyncpa [#allocation5], 0  ;;  %s111_s12 = smov [#allocation2]   ;;  %s112_s14 = smov [#allocation4]  }
   0x2   :  { %s16_s13 = sshll.u32 %s111_s12, 4  ;;  %s26_s15 = sshll.u32 %s112_s14, 4  ;;  %s17_s13 = int_to_ptr.vmem [resolvable:$true] %s16_s13  ;;  %s27_s15 = int_to_ptr.vmem [resolvable:$true] %s26_s15 }
   0x3   :  { %s63_s18 = scalar_lea.hbm %s163_s0, 256 }
   0x4   :  { %p64_p0 = scmp.ne.s32.totalorder %s163_s0, %s63_s18  ;;  %p67_p1 = scmp.lt.u32.totalorder %s63_s18, %s163_s0 }
   0x6   :  { %p69_p2 = pnand %p67_p1, %p64_p0 }
   0x8   :  { %72 = shalt.err (!%p69_p2)
}
   0x9   :  { %s73_s23 = scalar_lea.vmem %s17_s13, 256  ;;  %p78_p4 = scmp.lt.s32.totalorder %s17_s13, %s17_s13 }
   0xa   :  { %p74_p3 = scmp.ne.s32.totalorder %s17_s13, %s73_s23  ;;  %p79_p5 = scmp.lt.s32.totalorder %s73_s23, %s73_s23 }
   0xc   :  { %p80_p6 = por %p79_p5, %p78_p4 }
   0xe   :  { %p81_p7 = pnand %p80_p6, %p74_p3 }
  0x10   :  { %84 = shalt.err (!%p81_p7)
}
  0x11   :  { %19 = dma.hbm_to_vmem [thread:$0]  %s163_s0, 256, %s17_s13, [#allocation3]  }
  0x12   :  { %s85_s28 = scalar_lea.hbm %s164_s1, 256 }
  0x13   :  { %p86_p8 = scmp.ne.s32.totalorder %s164_s1, %s85_s28  ;;  %p89_p9 = scmp.lt.u32.totalorder %s85_s28, %s164_s1 }
  0x15   :  { %p91_p10 = pnand %p89_p9, %p86_p8 }
  0x17   :  { %94 = shalt.err (!%p91_p10)
}
  0x18   :  { %s95_s6 = scalar_lea.vmem %s27_s15, 256  ;;  %p100_p12 = scmp.lt.s32.totalorder %s27_s15, %s27_s15 }
  0x19   :  { %p96_p11 = scmp.ne.s32.totalorder %s27_s15, %s95_s6  ;;  %p101_p13 = scmp.lt.s32.totalorder %s95_s6, %s95_s6 }
  0x1b   :  { %p102_p0 = por %p101_p13, %p100_p12 }
  0x1d   :  { %p103_p1 = pnand %p102_p0, %p96_p11 }
  0x1f   :  { %106 = shalt.err (!%p103_p1)
}
  0x20   :  { %29 = dma.hbm_to_vmem [thread:$0]  %s164_s1, 256, %s27_s15, [#allocation5]  }
  0x21   :  { %107 = dma.done.wait [#allocation3], 256  }
  0x22   :  { %108 = vsyncadd [#allocation3], 4294967040 }
  0x23   :  { %109 = dma.done.wait [#allocation5], 256  }
  0x24   :  { %110 = vsyncadd [#allocation5], 4294967040  ;;  %v38_v0 = vld [vmem:[#allocation2] sm:$0xff]  ;;  %v39_v1 = vld [vmem:[#allocation2 + $0x8] sm:$0xff]  ;;  %vm53_vm0 = vcmask 7168  }
  0x25   :  { %v40_v2 = vld [vmem:[#allocation4] sm:$0xff]  ;;  %v41_v3 = vld [vmem:[#allocation4 + $0x8] sm:$0xff]  ;;  %v50_v9 = vld [vmem:[%s165_s2] sm:$0xff] }
  0x26   :  { %v42_v4 = vsub.f32 %v38_v0, %v40_v2  ;;  %v43_v5 = vsub.f32 %v39_v1, %v41_v3  ;;  %v51_v10 = vmul.f32 0.5, %v50_v9 }
  0x28   :  { %v44_v6 = vmul.f32 %v42_v4, %v42_v4  ;;  %v45_v7 = vmul.f32 %v43_v5, %v43_v5 }
  0x2a   :  { %v46_v8 = vadd.f32 %v45_v7, %v44_v6 }
  0x2c   :  { %47 = vadd.xlane.f32.xlu0 %v46_v8 }
  0xb9   :  { %v48_v11 = vpop.xlane.xlu0 %47 }
  0xba   :  { %v49_v12 = vmul.f32 0.00390625, %v48_v11 }
  0xbc   :  { %v52_v13 = vmul.f32 %v51_v10, %v49_v12 }
  0xbe   :  { %54 = vst.msk [vmem:[%s166_s3] sm:$0xff] %vm53_vm0, %v52_v13 }
  0xbf   :  { %59 = vsyncpa [#allocation3], 1 }
  0xc0   :  { %60 = vsyncpa [#allocation5], 1 }

</bundles_post_ra>
